<compile_context>
chip_gen: v7x
topology: tpu7x:2x2x1
jax: 0.10.0
libtpu: 0.0.40
codegen_flags: <defaults>
</compile_context>

<pallas_src>
import math
import jax
import jax.numpy as jnp
from jax.experimental import pallas as pl
from jax.experimental.pallas import tpu as pltpu

_W3_ROWS = 8  # layer-3 weight row padded to 8 sublanes (row 0 is the real w3)


def _leaky_relu(x, slope=0.2):
    return jnp.where(x > 0, x, slope * x)


def _mlp_tail(x_bf16, w1_ref, b1_ref, w2_ref, b2_ref, w3r_ref, b3_ref, out_ref):
    """Shared MLP body for one batch tile.

    x_bf16: (block_b, d_in) bf16.  Matmuls run bf16 on the MXU with f32
    accumulation; bias/LeakyReLU/sigmoid stay f32.  Layer 3 contracts the
    last dims of (8, 256) w3 and (block_b, 256) h2 (A.B^T, the standard
    flash-attention dot_general), producing a lane-dense (·, block_b) row.
    """
    # ---- Layer 1: single K = d_in dot ----
    h1 = jnp.dot(x_bf16, w1_ref[...], preferred_element_type=jnp.float32)
    h1 = _leaky_relu(h1 + b1_ref[...])

    # ---- Layer 2 ----
    h2 = jnp.dot(h1.astype(w2_ref.dtype), w2_ref[...],
                 preferred_element_type=jnp.float32)
    h2 = _leaky_relu(h2 + b2_ref[...])

    # ---- Layer 3 (out_features = 1), emitted as a lane-dense row ----
    h3 = jax.lax.dot_general(
        w3r_ref[...], h2.astype(w3r_ref.dtype),
        dimension_numbers=(((1,), (1,)), ((), ())),
        preferred_element_type=jnp.float32)               # (8, block_b)
    out_ref[0] = jax.nn.sigmoid(h3[0:1, :] + b3_ref[...]).astype(out_ref.dtype)


def _disc_kernel_cat(x_ref, c_ref, w1_ref, b1_ref, w2_ref, b2_ref, w3r_ref,
                     b3_ref, out_ref, cat_ref):
    """torch.cat([x, context], -1) done once in a VMEM f32 scratch, then the
    full MLP with a single K = d_in layer-1 matmul."""
    dx = x_ref.shape[1]
    cat_ref[:, :dx] = x_ref[...]
    cat_ref[:, dx:] = c_ref[...]
    _mlp_tail(cat_ref[...].astype(w1_ref.dtype),
              w1_ref, b1_ref, w2_ref, b2_ref, w3r_ref, b3_ref, out_ref)


def _disc_kernel_nocat(x_ref, w1_ref, b1_ref, w2_ref, b2_ref, w3r_ref,
                       b3_ref, out_ref):
    """context=None path: x already carries data_dim + condition_dim features."""
    _mlp_tail(x_ref[...].astype(w1_ref.dtype),
              w1_ref, b1_ref, w2_ref, b2_ref, w3r_ref, b3_ref, out_ref)


def _round_up(n, m):
    return ((n + m - 1) // m) * m


def _choose_block_b(batch, target=512):
    """Biggest useful batch tile (<= 512 rows): one tile for small batches,
    512-row tiles for big ones.  No single-tile splitting (v5e/v6e have one
    TensorCore; on v7x big batches give >= 2 blocks anyway)."""
    if batch >= target:
        return target
    bb = _round_up(batch, 16)          # full bf16 sublane packing
    if bb > batch:                     # prefer an exact-fit tile when possible
        bb = _round_up(batch, 8)
    return bb


def discriminator_forward(x, context, params, *, block_b=None):
    """x: (B, data_dim); context: (B, condition_dim) or None -> (B, 1).

    If context is None, x must already carry data_dim + condition_dim
    features (same contract as the PyTorch module's first Linear)."""
    w1, b1, w2, b2, w3, b3 = params
    d_in, h1_dim = w1.shape            # (data_dim + condition_dim, 512)
    h2_dim = w2.shape[1]               # 256
    B = x.shape[0]

    if block_b is None:
        block_b = _choose_block_b(B)
    block_b = _round_up(block_b, 8)
    n_blocks = pl.cdiv(B, block_b)     # no input padding; last block may be partial

    # MXU operands in bf16 (accumulation stays f32 inside the kernel).
    w1c = w1.astype(jnp.bfloat16)
    w2c = w2.astype(jnp.bfloat16)
    # Layer-3 weight as an (8, 256) bf16 slab (row 0 = w3, rest zero) so the
    # A.B^T dot has a full sublane tile.
    w3p = jnp.zeros((_W3_ROWS, h2_dim), jnp.float32)
    w3p = w3p.at[0, :].set(w3.reshape(-1)).astype(jnp.bfloat16)
    b1r = b1.reshape(1, h1_dim).astype(jnp.float32)
    b2r = b2.reshape(1, h2_dim).astype(jnp.float32)
    b3r = b3.reshape(1, 1).astype(jnp.float32)

    weight_specs = [
        pl.BlockSpec((d_in, h1_dim), lambda i: (0, 0)),      # W1 (resident)
        pl.BlockSpec((1, h1_dim), lambda i: (0, 0)),         # b1
        pl.BlockSpec((h1_dim, h2_dim), lambda i: (0, 0)),    # W2 (resident)
        pl.BlockSpec((1, h2_dim), lambda i: (0, 0)),         # b2
        pl.BlockSpec((_W3_ROWS, h2_dim), lambda i: (0, 0)),  # w3 rows (resident)
        pl.BlockSpec((1, 1), lambda i: (0, 0)),              # b3
    ]
    # Lane-dense output: each grid step writes one full (1, 1, block_b) row.
    out_shape = jax.ShapeDtypeStruct((n_blocks, 1, block_b), jnp.float32)
    out_spec = pl.BlockSpec((1, 1, block_b), lambda i: (i, 0, 0))

    cost = pl.CostEstimate(
        flops=int(2 * B * (d_in * h1_dim + h1_dim * h2_dim + h2_dim)),
        transcendentals=int(B),
        bytes_accessed=int(4 * B * d_in + 4 * B
                           + 2 * (d_in * h1_dim + h1_dim * h2_dim + h2_dim)),
    )
    cparams = pltpu.CompilerParams(dimension_semantics=("parallel",))

    if context is None:
        assert x.shape[1] == d_in, "x must carry data_dim+condition_dim features"
        x32 = x.astype(jnp.float32)
        grid_spec = pltpu.PrefetchScalarGridSpec(
            num_scalar_prefetch=0,
            grid=(n_blocks,),
            in_specs=[pl.BlockSpec((block_b, d_in), lambda i: (i, 0))] + weight_specs,
            out_specs=out_spec,
        )
        out = pl.pallas_call(
            _disc_kernel_nocat, out_shape=out_shape, grid_spec=grid_spec,
            compiler_params=cparams, cost_estimate=cost,
        )(x32, w1c, b1r, w2c, b2r, w3p, b3r)
    else:
        dx, dc = x.shape[1], context.shape[1]
        assert dx + dc == d_in, "feature dims must sum to W1's fan-in"
        x32 = x.astype(jnp.float32)
        c32 = context.astype(jnp.float32)
        grid_spec = pltpu.PrefetchScalarGridSpec(
            num_scalar_prefetch=0,
            grid=(n_blocks,),
            in_specs=[pl.BlockSpec((block_b, dx), lambda i: (i, 0)),
                      pl.BlockSpec((block_b, dc), lambda i: (i, 0))] + weight_specs,
            out_specs=out_spec,
            scratch_shapes=[pltpu.VMEM((block_b, d_in), jnp.float32)],  # concat buffer
        )
        out = pl.pallas_call(
            _disc_kernel_cat, out_shape=out_shape, grid_spec=grid_spec,
            compiler_params=cparams, cost_estimate=cost,
        )(x32, c32, w1c, b1r, w2c, b2r, w3p, b3r)

    # Drop the (garbage) tail rows of the last partial block and restore (B, 1).
    return out.reshape(-1)[:B].reshape(B, 1).astype(x.dtype)


def init_params(key, data_dim, condition_dim):
    """PyTorch nn.Linear default init (uniform +-1/sqrt(fan_in)); weights stored
    as (in_features, out_features) so the kernel computes x @ W + b."""
    dims = [(data_dim + condition_dim, 512), (512, 256), (256, 1)]
    params = []
    keys = jax.random.split(key, 2 * len(dims))
    for idx, (fan_in, fan_out) in enumerate(dims):
        bound = 1.0 / math.sqrt(fan_in)
        w = jax.random.uniform(keys[2 * idx], (fan_in, fan_out),
                               minval=-bound, maxval=bound, dtype=jnp.float32)
        b = jax.random.uniform(keys[2 * idx + 1], (fan_out,),
                               minval=-bound, maxval=bound, dtype=jnp.float32)
        params += [w, b]
    return tuple(params)


def reference_forward(x, context, params):
    """Pure-f32 JAX reference (exactly the PyTorch math)."""
    if context is not None:
        x = jnp.concatenate([x, context], axis=-1)
    w1, b1, w2, b2, w3, b3 = params
    h = x @ w1 + b1
    h = jnp.where(h > 0, h, 0.2 * h)
    h = h @ w2 + b2
    h = jnp.where(h > 0, h, 0.2 * h)
    h = h @ w3 + b3
    return jax.nn.sigmoid(h)


def matched_reference(x, context, params):
    """Pure-JAX reference replicating the kernel's bf16-MXU / f32-accumulate math."""
    w1, b1, w2, b2, w3, b3 = params
    xin = x if context is None else jnp.concatenate([x, context], axis=-1)
    bf = jnp.bfloat16
    h1 = jnp.dot(xin.astype(bf), w1.astype(bf),
                 preferred_element_type=jnp.float32) + b1
    h1 = jnp.where(h1 > 0, h1, 0.2 * h1)
    h2 = jnp.dot(h1.astype(bf), w2.astype(bf),
                 preferred_element_type=jnp.float32) + b2
    h2 = jnp.where(h2 > 0, h2, 0.2 * h2)
    h3 = jnp.dot(h2.astype(bf), w3.astype(bf),
                 preferred_element_type=jnp.float32) + b3
    return jax.nn.sigmoid(h3)


if __name__ == "__main__":
    data_dim = 32
    condition_dim = 16
    batch = 8

    key = jax.random.PRNGKey(0)
    k_params, k_x, k_c = jax.random.split(key, 3)

    params = init_params(k_params, data_dim, condition_dim)
    x = jax.random.normal(k_x, (batch, data_dim), dtype=jnp.float32)
    context = jax.random.normal(k_c, (batch, condition_dim), dtype=jnp.float32)

    out = jax.block_until_ready(discriminator_forward(x, context, params))
    assert out.shape == (batch, 1), out.shape

    # Tight check vs a reference mirroring the kernel's bf16/f32 math.
    ref_matched = matched_reference(x, context, params)
    assert jnp.allclose(out, ref_matched, atol=5e-4, rtol=5e-4), "mismatch vs matched reference"
    # Loose check vs pure-f32 PyTorch-equivalent math (bf16 matmul rounding).
    ref_f32 = reference_forward(x, context, params)
    assert jnp.allclose(out, ref_f32, atol=2e-2, rtol=2e-2), "mismatch vs f32 reference"

    # context=None path (input already carries data_dim + condition_dim features).
    x_full = jnp.concatenate([x, context], axis=-1)
    out2 = jax.block_until_ready(discriminator_forward(x_full, None, params))
    assert out2.shape == (batch, 1), out2.shape
    assert jnp.allclose(out2, ref_matched, atol=5e-4, rtol=5e-4), "mismatch on context=None path"

    print("KERNEL_OK")
</pallas_src>

<mosaic_0001>
module attributes {stable_mosaic.version = 11 : i64} {
  func.func @_disc_kernel_cat(%arg0: i32, %arg1: memref<8x32xf32, #tpu.memory_space<vmem>>, %arg2: memref<8x16xf32, #tpu.memory_space<vmem>>, %arg3: memref<48x512xbf16, #tpu.memory_space<vmem>>, %arg4: memref<1x512xf32, #tpu.memory_space<vmem>>, %arg5: memref<512x256xbf16, #tpu.memory_space<vmem>>, %arg6: memref<1x256xf32, #tpu.memory_space<vmem>>, %arg7: memref<8x256xbf16, #tpu.memory_space<vmem>>, %arg8: memref<1x1xf32, #tpu.memory_space<vmem>>, %arg9: memref<1x1x8xf32, #tpu.memory_space<vmem>>, %arg10: memref<8x48xf32, #tpu.memory_space<vmem>>) attributes {dimension_semantics = [#tpu.dimension_semantics<parallel>], iteration_bounds = array<i64: 1>, scalar_prefetch = 0 : i64, scratch_operands = 1 : i64, tpu.core_type = #tpu.core_type<tc>, window_params = [{transform_indices = @transform_0, window_bounds = array<i64: 8, 32>}, {transform_indices = @transform_1, window_bounds = array<i64: 8, 16>}, {pipeline_mode = #tpu.pipeline_mode<synchronous>, transform_indices = @transform_2, window_bounds = array<i64: 48, 512>}, {pipeline_mode = #tpu.pipeline_mode<synchronous>, transform_indices = @transform_3, window_bounds = array<i64: 1, 512>}, {pipeline_mode = #tpu.pipeline_mode<synchronous>, transform_indices = @transform_4, window_bounds = array<i64: 512, 256>}, {pipeline_mode = #tpu.pipeline_mode<synchronous>, transform_indices = @transform_5, window_bounds = array<i64: 1, 256>}, {pipeline_mode = #tpu.pipeline_mode<synchronous>, transform_indices = @transform_6, window_bounds = array<i64: 8, 256>}, {pipeline_mode = #tpu.pipeline_mode<synchronous>, transform_indices = @transform_7, window_bounds = array<i64: 1, 1>}, {transform_indices = @transform_8, window_bounds = array<i64: 1, 1, 8>}]} {
    %c0 = arith.constant 0 : index
    %c0_0 = arith.constant 0 : index
    %0 = vector.load %arg1[%c0, %c0_0] : memref<8x32xf32, #tpu.memory_space<vmem>>, vector<8x32xf32>
    %c0_1 = arith.constant 0 : index
    %c0_2 = arith.constant 0 : index
    %1 = vector.load %arg10[%c0_1, %c0_2] : memref<8x48xf32, #tpu.memory_space<vmem>>, vector<8x32xf32>
    tpu.vector_store %arg10[%c0_1, %c0_2], %0 {strides = array<i32>} : memref<8x48xf32, #tpu.memory_space<vmem>>, vector<8x32xf32>,
    %c0_3 = arith.constant 0 : index
    %c0_4 = arith.constant 0 : index
    %2 = vector.load %arg2[%c0_3, %c0_4] : memref<8x16xf32, #tpu.memory_space<vmem>>, vector<8x16xf32>
    %c0_5 = arith.constant 0 : index
    %c32 = arith.constant 32 : index
    %3 = vector.load %arg10[%c0_5, %c32] : memref<8x48xf32, #tpu.memory_space<vmem>>, vector<8x16xf32>
    tpu.vector_store %arg10[%c0_5, %c32], %2 {strides = array<i32>} : memref<8x48xf32, #tpu.memory_space<vmem>>, vector<8x16xf32>,
    %c0_6 = arith.constant 0 : index
    %c0_7 = arith.constant 0 : index
    %4 = vector.load %arg10[%c0_6, %c0_7] : memref<8x48xf32, #tpu.memory_space<vmem>>, vector<8x48xf32>
    %5 = arith.truncf %4 : vector<8x48xf32> to vector<8x48xbf16>
    %c0_8 = arith.constant 0 : index
    %c0_9 = arith.constant 0 : index
    %6 = vector.load %arg3[%c0_8, %c0_9] : memref<48x512xbf16, #tpu.memory_space<vmem>>, vector<48x512xbf16>
    %cst = arith.constant dense<0.000000e+00> : vector<8x512xf32>
    %7 = tpu.matmul %5, %6, %cst {dimension_numbers = #tpu.dot_dimension_numbers<[1], [0], [0], [1], [0, 0, 1, 1], [], []>} : vector<8x48xbf16>, vector<48x512xbf16>, vector<8x512xf32> -> vector<8x512xf32>
    %c0_10 = arith.constant 0 : index
    %c0_11 = arith.constant 0 : index
    %8 = vector.load %arg4[%c0_10, %c0_11] : memref<1x512xf32, #tpu.memory_space<vmem>>, vector<1x512xf32>
    %9 = vector.broadcast %8 : vector<1x512xf32> to vector<8x512xf32>
    %10 = arith.addf %7, %9 : vector<8x512xf32>
    %cst_12 = arith.constant 0.000000e+00 : f32
    %11 = vector.broadcast %cst_12 : f32 to vector<8x512xf32>
    %12 = arith.cmpf ogt, %10, %11 : vector<8x512xf32>
    %cst_13 = arith.constant 2.000000e-01 : f32
    %13 = vector.broadcast %cst_13 : f32 to vector<8x512xf32>
    %14 = arith.mulf %13, %10 : vector<8x512xf32>
    %15 = arith.select %12, %10, %14 : vector<8x512xi1>, vector<8x512xf32>
    %16 = arith.truncf %15 : vector<8x512xf32> to vector<8x512xbf16>
    %c0_14 = arith.constant 0 : index
    %c0_15 = arith.constant 0 : index
    %17 = vector.load %arg5[%c0_14, %c0_15] : memref<512x256xbf16, #tpu.memory_space<vmem>>, vector<512x256xbf16>
    %cst_16 = arith.constant dense<0.000000e+00> : vector<8x256xf32>
    %18 = tpu.matmul %16, %17, %cst_16 {dimension_numbers = #tpu.dot_dimension_numbers<[1], [0], [0], [1], [0, 0, 1, 1], [], []>} : vector<8x512xbf16>, vector<512x256xbf16>, vector<8x256xf32> -> vector<8x256xf32>
    %c0_17 = arith.constant 0 : index
    %c0_18 = arith.constant 0 : index
    %19 = vector.load %arg6[%c0_17, %c0_18] : memref<1x256xf32, #tpu.memory_space<vmem>>, vector<1x256xf32>
    %20 = vector.broadcast %19 : vector<1x256xf32> to vector<8x256xf32>
    %21 = arith.addf %18, %20 : vector<8x256xf32>
    %cst_19 = arith.constant 0.000000e+00 : f32
    %22 = vector.broadcast %cst_19 : f32 to vector<8x256xf32>
    %23 = arith.cmpf ogt, %21, %22 : vector<8x256xf32>
    %cst_20 = arith.constant 2.000000e-01 : f32
    %24 = vector.broadcast %cst_20 : f32 to vector<8x256xf32>
    %25 = arith.mulf %24, %21 : vector<8x256xf32>
    %26 = arith.select %23, %21, %25 : vector<8x256xi1>, vector<8x256xf32>
    %c0_21 = arith.constant 0 : index
    %c0_22 = arith.constant 0 : index
    %27 = vector.load %arg7[%c0_21, %c0_22] : memref<8x256xbf16, #tpu.memory_space<vmem>>, vector<8x256xbf16>
    %28 = arith.truncf %26 : vector<8x256xf32> to vector<8x256xbf16>
    %cst_23 = arith.constant dense<0.000000e+00> : vector<8x8xf32>
    %29 = tpu.matmul %27, %28, %cst_23 {dimension_numbers = #tpu.dot_dimension_numbers<[1], [1], [0], [0], [0, 0, 1, 0], [], []>} : vector<8x256xbf16>, vector<8x256xbf16>, vector<8x8xf32> -> vector<8x8xf32>
    %30 = vector.extract_strided_slice %29 {offsets = [0, 0], sizes = [1, 8], strides = [1, 1]} : vector<8x8xf32> to vector<1x8xf32>
    %c0_24 = arith.constant 0 : index
    %c0_25 = arith.constant 0 : index
    %31 = vector.load %arg8[%c0_24, %c0_25] : memref<1x1xf32, #tpu.memory_space<vmem>>, vector<1x1xf32>
    %32 = vector.broadcast %31 : vector<1x1xf32> to vector<1x8xf32>
    %33 = arith.addf %30, %32 : vector<1x8xf32>
    %34 = arith.negf %33 : vector<1x8xf32>
    %35 = math.exp %34 : vector<1x8xf32>
    %cst_26 = arith.constant 1.000000e+00 : f32
    %36 = vector.broadcast %cst_26 : f32 to vector<1x8xf32>
    %37 = arith.addf %36, %35 : vector<1x8xf32>
    %38 = arith.divf %36, %37 : vector<1x8xf32>
    %c0_27 = arith.constant 0 : index
    %c0_28 = arith.constant 0 : index
    %c0_29 = arith.constant 0 : index
    %39 = vector.load %arg9[%c0_27, %c0_28, %c0_29] : memref<1x1x8xf32, #tpu.memory_space<vmem>>, vector<1x1x8xf32>
    %40 = vector.shape_cast %39 : vector<1x1x8xf32> to vector<1x8xf32>
    %41 = vector.shape_cast %38 : vector<1x8xf32> to vector<1x1x8xf32>
    tpu.vector_store %arg9[%c0_27, %c0_28, %c0_29], %41 {strides = array<i32>} : memref<1x1x8xf32, #tpu.memory_space<vmem>>, vector<1x1x8xf32>,
    return
  }
  func.func @transform_0(%arg0: i32) -> (i32, i32) {
    %c0_i32 = arith.constant 0 : i32
    %c0_i32_0 = arith.constant 0 : i32
    return %arg0, %c0_i32 : i32, i32
  }
  func.func @transform_1(%arg0: i32) -> (i32, i32) {
    %c0_i32 = arith.constant 0 : i32
    %c0_i32_0 = arith.constant 0 : i32
    return %arg0, %c0_i32 : i32, i32
  }
  func.func @transform_2(%arg0: i32) -> (i32, i32) {
    %c0_i32 = arith.constant 0 : i32
    %c0_i32_0 = arith.constant 0 : i32
    %c0_i32_1 = arith.constant 0 : i32
    return %c0_i32, %c0_i32_0 : i32, i32
  }
  func.func @transform_3(%arg0: i32) -> (i32, i32) {
    %c0_i32 = arith.constant 0 : i32
    %c0_i32_0 = arith.constant 0 : i32
    %c0_i32_1 = arith.constant 0 : i32
    return %c0_i32, %c0_i32_0 : i32, i32
  }
  func.func @transform_4(%arg0: i32) -> (i32, i32) {
    %c0_i32 = arith.constant 0 : i32
    %c0_i32_0 = arith.constant 0 : i32
    %c0_i32_1 = arith.constant 0 : i32
    return %c0_i32, %c0_i32_0 : i32, i32
  }
  func.func @transform_5(%arg0: i32) -> (i32, i32) {
    %c0_i32 = arith.constant 0 : i32
    %c0_i32_0 = arith.constant 0 : i32
    %c0_i32_1 = arith.constant 0 : i32
    return %c0_i32, %c0_i32_0 : i32, i32
  }
  func.func @transform_6(%arg0: i32) -> (i32, i32) {
    %c0_i32 = arith.constant 0 : i32
    %c0_i32_0 = arith.constant 0 : i32
    %c0_i32_1 = arith.constant 0 : i32
    return %c0_i32, %c0_i32_0 : i32, i32
  }
  func.func @transform_7(%arg0: i32) -> (i32, i32) {
    %c0_i32 = arith.constant 0 : i32
    %c0_i32_0 = arith.constant 0 : i32
    %c0_i32_1 = arith.constant 0 : i32
    return %c0_i32, %c0_i32_0 : i32, i32
  }
  func.func @transform_8(%arg0: i32) -> (i32, i32, i32) {
    %c0_i32 = arith.constant 0 : i32
    %c0_i32_0 = arith.constant 0 : i32
    %c0_i32_1 = arith.constant 0 : i32
    return %arg0, %c0_i32, %c0_i32_0 : i32, i32, i32
  }
}

</mosaic_0001>

<bundles_post_ra>
// kernel: tpu_custom_call.1
= control target key start
LH: loop header
LB: loop body
LE: loop exit
PB: predicated region body
PF: predicated region fallthrough
CT: control target
= control target key end

     0   :  { %s1330_s0 = inlined_call_operand.hbm [shape: f32[8,32], index: 0, kind: input, shape index: {}]   ;;  %s1331_s1 = inlined_call_operand.hbm [shape: f32[8,16], index: 1, kind: input, shape index: {}]   ;;  %s1332_s2 = inlined_call_operand.hbm [shape: bf16[48,512], index: 2, kind: input, shape index: {}]   ;;  %s1333_s3 = inlined_call_operand.vmem [shape: f32[1,512], index: 3, kind: input, shape index: {}]   ;;  %s1334_s4 = inlined_call_operand.hbm [shape: bf16[512,256], index: 4, kind: input, shape index: {}]   ;;  %s1335_s5 = inlined_call_operand.vmem [shape: f32[1,256], index: 5, kind: input, shape index: {}]   ;;  %s1336_s6 = inlined_call_operand.vmem [shape: bf16[8,256], index: 6, kind: input, shape index: {}]   ;;  %s1337_s7 = inlined_call_operand.<no memory space> [shape: f32[1,1], index: 7, kind: input, shape index: {}]   ;;  %s1338_s8 = inlined_call_operand.hbm [shape: f32[1,1,8], index: 8, kind: output, shape index: {}]  }
   0x1   :  { %v13_v0 = vstv %s1337_s7 }
   0x2   :  { %14 = vst [vmem:[#allocation3] sm:$0x1] %v13_v0 }
   0x3   :  { %15 = vsyncpa [#allocation5], 0 }
   0x4   :  { %16 = vsyncpa [#allocation8], 0 }
   0x5   :  { %17 = vsyncpa [#allocation11], 0 }
   0x6   :  { %18 = vsyncpa [#allocation6], 0  ;;  %s1197_s29 = smov [#allocation7]   ;;  %s1198_s9 = smov [#allocation4]  }
   0x7   :  { %s35_s30 = sshll.u32 %s1197_s29, 4  ;;  %s25_s10 = sshll.u32 %s1198_s9, 4  ;;  %s36_s30 = int_to_ptr.vmem [resolvable:$true] %s35_s30  ;;  %s26_s10 = int_to_ptr.vmem [resolvable:$true] %s25_s10 }
   0x8   :  { %s1079_s13 = scalar_lea.hbm %s1331_s1, 128 }
   0x9   :  { %p1080_p0 = scmp.ne.s32.totalorder %s1331_s1, %s1079_s13  ;;  %p1083_p1 = scmp.lt.u32.totalorder %s1079_s13, %s1331_s1 }
   0xb   :  { %p1085_p2 = pnand %p1083_p1, %p1080_p0 }
   0xd   :  { %1088 = shalt.err (!%p1085_p2)
}
   0xe   :  { %s1089_s17 = scalar_lea.vmem %s36_s30, 128  ;;  %p1094_p4 = scmp.lt.s32.totalorder %s36_s30, %s36_s30 }
   0xf   :  { %p1090_p3 = scmp.ne.s32.totalorder %s36_s30, %s1089_s17  ;;  %p1095_p5 = scmp.lt.s32.totalorder %s1089_s17, %s1089_s17 }
  0x11   :  { %p1096_p6 = por %p1095_p5, %p1094_p4 }
  0x13   :  { %p1097_p7 = pnand %p1096_p6, %p1090_p3 }
  0x15   :  { %1100 = shalt.err (!%p1097_p7)
}
  0x16   :  { %38 = dma.hbm_to_vmem [thread:$0]  %s1331_s1, 128, %s36_s30, [#allocation8]  }
  0x17   :  { %s1101_s22 = scalar_lea.hbm %s1330_s0, 128 }
  0x18   :  { %p1102_p8 = scmp.ne.s32.totalorder %s1330_s0, %s1101_s22  ;;  %p1105_p9 = scmp.lt.u32.totalorder %s1101_s22, %s1330_s0 }
  0x1a   :  { %p1107_p10 = pnand %p1105_p9, %p1102_p8 }
  0x1c   :  { %1110 = shalt.err (!%p1107_p10)
}
  0x1d   :  { %s1111_s27 = scalar_lea.vmem %s26_s10, 128  ;;  %p1116_p12 = scmp.lt.s32.totalorder %s26_s10, %s26_s10 }
  0x1e   :  { %p1112_p11 = scmp.ne.s32.totalorder %s26_s10, %s1111_s27  ;;  %p1117_p13 = scmp.lt.s32.totalorder %s1111_s27, %s1111_s27 }
  0x20   :  { %p1118_p0 = por %p1117_p13, %p1116_p12 }
  0x22   :  { %p1119_p1 = pnand %p1118_p0, %p1112_p11 }
  0x24   :  { %1122 = shalt.err (!%p1119_p1)
}
  0x25   :  { %28 = dma.hbm_to_vmem [thread:$0]  %s1330_s0, 128, %s26_s10, [#allocation5]  }
  0x26   :  { %s1199_s29 = smov [#allocation9]   ;;  %s1123_s12 = scalar_lea.hbm %s1332_s2, 1536 }
  0x27   :  { %s44_s30 = sshll.u32 %s1199_s29, 4  ;;  %p1124_p2 = scmp.ne.s32.totalorder %s1332_s2, %s1123_s12  ;;  %s45_s30 = int_to_ptr.vmem [resolvable:$true] %s44_s30 }
  0x28   :  { %p1127_p3 = scmp.lt.u32.totalorder %s1123_s12, %s1332_s2 }
  0x2a   :  { %p1129_p4 = pnand %p1127_p3, %p1124_p2 }
  0x2c   :  { %1132 = shalt.err (!%p1129_p4)
}
  0x2d   :  { %s1133_s16 = scalar_lea.vmem %s45_s30, 1536  ;;  %p1138_p6 = scmp.lt.s32.totalorder %s45_s30, %s45_s30 }
  0x2e   :  { %p1134_p5 = scmp.ne.s32.totalorder %s45_s30, %s1133_s16  ;;  %p1139_p7 = scmp.lt.s32.totalorder %s1133_s16, %s1133_s16 }
  0x30   :  { %p1140_p8 = por %p1139_p7, %p1138_p6 }
  0x32   :  { %p1141_p9 = pnand %p1140_p8, %p1134_p5 }
  0x34   :  { %1144 = shalt.err (!%p1141_p9)
}
  0x35   :  { %s1200_s0 = smov 256   ;;  %s1201_s10 = smov 16  }
  0x36   :  { %50 = dma.hbm_to_vmem [thread:$0]  %s1332_s2, 1536, %s45_s30, [#allocation8], %s1200_s0, %s1200_s0, %s1201_s10  }
  0x37   :  { %s1202_s19 = smov [#allocation10]   ;;  %s1145_s23 = scalar_lea.hbm %s1334_s4, 8192 }
  0x38   :  { %s58_s20 = sshll.u32 %s1202_s19, 4  ;;  %p1146_p10 = scmp.ne.s32.totalorder %s1334_s4, %s1145_s23  ;;  %s59_s20 = int_to_ptr.vmem [resolvable:$true] %s58_s20 }
  0x39   :  { %p1149_p11 = scmp.lt.u32.totalorder %s1145_s23, %s1334_s4 }
  0x3b   :  { %p1151_p12 = pnand %p1149_p11, %p1146_p10 }
  0x3d   :  { %1154 = shalt.err (!%p1151_p12)
}
  0x3e   :  { %s1155_s1 = scalar_lea.vmem %s59_s20, 8192  ;;  %p1160_p0 = scmp.lt.s32.totalorder %s59_s20, %s59_s20 }
  0x3f   :  { %p1156_p13 = scmp.ne.s32.totalorder %s59_s20, %s1155_s1  ;;  %p1161_p1 = scmp.lt.s32.totalorder %s1155_s1, %s1155_s1 }
  0x41   :  { %p1162_p2 = por %p1161_p1, %p1160_p0 }
  0x43   :  { %p1163_p3 = pnand %p1162_p2, %p1156_p13 }
  0x45   :  { %1166 = shalt.err (!%p1163_p3)
}
  0x46   :  { %s1203_s2 = smov 128   ;;  %s1204_s28 = smov 8  }
  0x47   :  { %64 = dma.hbm_to_vmem [thread:$0]  %s1334_s4, 8192, %s59_s20, [#allocation11], %s1203_s2, %s1203_s2, %s1204_s28  }
  0x48   :  { %1189 = dma.done.wait [#allocation5], 128  }
  0x49   :  { %1190 = vsyncadd [#allocation5], 4294967168 }
  0x4a   :  { %1191 = dma.done.wait [#allocation8], 1664  }
  0x4b   :  { %1192 = vsyncadd [#allocation8], 4294965632 }
  0x4c   :  { %1193 = dma.done.wait [#allocation11], 8192  }
  0x4d   :  { %1194 = vsyncadd [#allocation11], 4294959104  ;;  %v1205_v1 = vmov 0   ;;  %v87_v2 = vld [vmem:[#allocation7] sm:$0xff]  ;;  %s1206_s9 = smov 32   ;;  %vm85_vm0 = vcmask 261120  }
  0x4e   :  { %226 = vmatprep.mubr.bf16.mxu0 %v1205_v1  ;;  %267 = vmatprep.mubr.bf16.mxu1 %v1205_v1  ;;  %v959_v3 = vld [vmem:[#allocation9 + $0x4] ss:$16 sps:$4 sm:$0xff]   ;;  %v961_v4 = vld [vmem:[#allocation9 + $0xc] ss:$16 sps:$4 sm:$0xff]   ;;  %v963_v5 = vld [vmem:[#allocation9] ss:$16 sps:$4 sm:$0xff]  }
  0x4f   :  { %958 = vset.pattern.permute.xlu0 %v1205_v1  ;;  %v964_v6 = vld [vmem:[#allocation9 + $0x8] ss:$16 sps:$4 sm:$0xff]   ;;  %194 = vmatprep.subr.bf16.mxu0 %v959_v3  ;;  %v84_v7 = vld [vmem:[#allocation4] sm:$0xff]  ;;  %v967_v9 = vld [vmem:[#allocation9 + $0x2c] ss:$16 sps:$4 sm:$0xff]   ;;  %vm92_vm1 = vcmask 392448  }
  0x50   :  { %89 = vrot.lane.b32.xlu0 %v87_v2, %s1206_s9  ;;  %235 = vmatprep.subr.bf16.mxu1 %v961_v4  ;;  %86 = vst.msk [vmem:[#allocation2] sm:$0xff] %vm85_vm0, %v84_v7  ;;  %v965_v8 = vld [vmem:[#allocation9 + $0x24] ss:$16 sps:$4 sm:$0xff]   ;;  %v969_v10 = vld [vmem:[#allocation9 + $0x20] ss:$16 sps:$4 sm:$0xff]   ;;  %vm190_vm2 = vcmask 392192  }
  0x51   :  { %195 = vmatpush1.bf16.msra.mxu0 %v963_v5  ;;  %236 = vmatpush1.bf16.msra.mxu1 %v964_v6  ;;  %v970_v11 = vld [vmem:[#allocation9 + $0x28] ss:$16 sps:$4 sm:$0xff]   ;;  %v971_v12 = vld [vmem:[#allocation9 + $0x44] ss:$16 sps:$4 sm:$0xff]   ;;  %v973_v13 = vld [vmem:[#allocation9 + $0x4c] ss:$16 sps:$4 sm:$0xff]  }
  0x52   :  { %196 = vmatprep.subr.bf16.mxu0 %v965_v8  ;;  %237 = vmatprep.subr.bf16.mxu1 %v967_v9  ;;  %v975_v14 = vld [vmem:[#allocation9 + $0x40] ss:$16 sps:$4 sm:$0xff]   ;;  %v976_v15 = vld [vmem:[#allocation9 + $0x48] ss:$16 sps:$4 sm:$0xff]   ;;  %v979_v16 = vld [vmem:[#allocation10 + $0x4] ss:$8 sps:$4 sm:$0xff]  }
  0x53   :  { %v982_v17 = vld [vmem:[#allocation10 + $0x104] ss:$8 sps:$4 sm:$0xff]   ;;  %v977_v20 = vld [vmem:[#allocation10] ss:$8 sps:$4 sm:$0xff]   ;;  %v985_v23 = vld [vmem:[#allocation10 + $0x14] ss:$8 sps:$4 sm:$0xff]  }
  0x54   :  { %v980_v21 = vld [vmem:[#allocation10 + $0x100] ss:$8 sps:$4 sm:$0xff]   ;;  %v988_v24 = vld [vmem:[#allocation10 + $0x114] ss:$8 sps:$4 sm:$0xff]   ;;  %v983_v25 = vld [vmem:[#allocation10 + $0x10] ss:$8 sps:$4 sm:$0xff]  }
  0x55   :  { %197 = vmatpush1.bf16.msra.mxu0 %v969_v10  ;;  %238 = vmatpush1.bf16.msra.mxu1 %v970_v11  ;;  %v986_v26 = vld [vmem:[#allocation10 + $0x110] ss:$8 sps:$4 sm:$0xff]   ;;  %v991_v27 = vld [vmem:[#allocation10 + $0x24] ss:$8 sps:$4 sm:$0xff]   ;;  %v989_v29 = vld [vmem:[#allocation10 + $0x20] ss:$8 sps:$4 sm:$0xff]  }
  0x56   :  { %198 = vmatprep.subr.bf16.mxu0 %v971_v12  ;;  %239 = vmatprep.subr.bf16.mxu1 %v973_v13  ;;  %v994_v28 = vld [vmem:[#allocation10 + $0x124] ss:$8 sps:$4 sm:$0xff]   ;;  %v992_v30 = vld [vmem:[#allocation10 + $0x120] ss:$8 sps:$4 sm:$0xff]   ;;  %v997_v31 = vld [vmem:[#allocation10 + $0x34] ss:$8 sps:$4 sm:$0xff]  }
  0x57   :  { %v1000_v32 = vld [vmem:[#allocation10 + $0x134] ss:$8 sps:$4 sm:$0xff]   ;;  %v995_v33 = vld [vmem:[#allocation10 + $0x30] ss:$8 sps:$4 sm:$0xff]   ;;  %v1003_v35 = vld [vmem:[#allocation10 + $0x44] ss:$8 sps:$4 sm:$0xff]  }
  0x58   :  { %v998_v34 = vld [vmem:[#allocation10 + $0x130] ss:$8 sps:$4 sm:$0xff]   ;;  %v1006_v36 = vld [vmem:[#allocation10 + $0x144] ss:$8 sps:$4 sm:$0xff]   ;;  %v1001_v37 = vld [vmem:[#allocation10 + $0x40] ss:$8 sps:$4 sm:$0xff]  }
  0x59   :  { %199 = vmatpush1.bf16.msra.mxu0 %v975_v14  ;;  %240 = vmatpush1.bf16.msra.mxu1 %v976_v15  ;;  %v1004_v38 = vld [vmem:[#allocation10 + $0x140] ss:$8 sps:$4 sm:$0xff]   ;;  %v1009_v39 = vld [vmem:[#allocation10 + $0x54] ss:$8 sps:$4 sm:$0xff]   ;;  %v1007_v41 = vld [vmem:[#allocation10 + $0x50] ss:$8 sps:$4 sm:$0xff]  }
  0x5a   :  { %729 = vmatprep.subr.bf16.mxu0 %v982_v17  ;;  %688 = vmatprep.subr.bf16.mxu1 %v979_v16  ;;  %v1012_v40 = vld [vmem:[#allocation10 + $0x154] ss:$8 sps:$4 sm:$0xff]   ;;  %v1010_v42 = vld [vmem:[#allocation10 + $0x150] ss:$8 sps:$4 sm:$0xff]   ;;  %v1015_v43 = vld [vmem:[#allocation10 + $0x64] ss:$8 sps:$4 sm:$0xff]  }
  0x5b   :  { %v1018_v44 = vld [vmem:[#allocation10 + $0x164] ss:$8 sps:$4 sm:$0xff]   ;;  %v1013_v45 = vld [vmem:[#allocation10 + $0x60] ss:$8 sps:$4 sm:$0xff]   ;;  %v1021_v47 = vld [vmem:[#allocation10 + $0x74] ss:$8 sps:$4 sm:$0xff]  }
  0x5c   :  { %v1016_v46 = vld [vmem:[#allocation10 + $0x160] ss:$8 sps:$4 sm:$0xff]   ;;  %v1024_v48 = vld [vmem:[#allocation10 + $0x174] ss:$8 sps:$4 sm:$0xff]   ;;  %v1019_v49 = vld [vmem:[#allocation10 + $0x70] ss:$8 sps:$4 sm:$0xff]  }
  0x5d   :  { %v1022_v50 = vld [vmem:[#allocation10 + $0x170] ss:$8 sps:$4 sm:$0xff]   ;;  %v1027_v51 = vld [vmem:[#allocation10 + $0x84] ss:$8 sps:$4 sm:$0xff]   ;;  %v1025_v53 = vld [vmem:[#allocation10 + $0x80] ss:$8 sps:$4 sm:$0xff]  }
  0x5e   :  { %v1030_v52 = vld [vmem:[#allocation10 + $0x184] ss:$8 sps:$4 sm:$0xff]   ;;  %v1028_v54 = vld [vmem:[#allocation10 + $0x180] ss:$8 sps:$4 sm:$0xff]   ;;  %v1033_v55 = vld [vmem:[#allocation10 + $0x94] ss:$8 sps:$4 sm:$0xff]  }
  0x5f   :  { %v1036_v56 = vld [vmem:[#allocation10 + $0x194] ss:$8 sps:$4 sm:$0xff]   ;;  %v1031_v57 = vld [vmem:[#allocation10 + $0x90] ss:$8 sps:$4 sm:$0xff]   ;;  %v1039_v59 = vld [vmem:[#allocation10 + $0xa4] ss:$8 sps:$4 sm:$0xff]  }
  0x60   :  { %v1034_v58 = vld [vmem:[#allocation10 + $0x190] ss:$8 sps:$4 sm:$0xff]   ;;  %v1042_v60 = vld [vmem:[#allocation10 + $0x1a4] ss:$8 sps:$4 sm:$0xff]   ;;  %v1037_v61 = vld [vmem:[#allocation10 + $0xa0] ss:$8 sps:$4 sm:$0xff]  }
  0x61   :  { %v1040_v62 = vld [vmem:[#allocation10 + $0x1a0] ss:$8 sps:$4 sm:$0xff]   ;;  %v1045_v63 = vld [vmem:[#allocation10 + $0xb4] ss:$8 sps:$4 sm:$0xff]   ;;  %v1043_v1 = vld [vmem:[#allocation10 + $0xb0] ss:$8 sps:$4 sm:$0xff]  }
  0x62   :  { %v1048_v0 = vld [vmem:[#allocation10 + $0x1b4] ss:$8 sps:$4 sm:$0xff]   ;;  %v1046_v2 = vld [vmem:[#allocation10 + $0x1b0] ss:$8 sps:$4 sm:$0xff]   ;;  %v1051_v3 = vld [vmem:[#allocation10 + $0xc4] ss:$8 sps:$4 sm:$0xff]  }
  0x63   :  { %v1054_v4 = vld [vmem:[#allocation10 + $0x1c4] ss:$8 sps:$4 sm:$0xff]   ;;  %v1049_v5 = vld [vmem:[#allocation10 + $0xc0] ss:$8 sps:$4 sm:$0xff]   ;;  %v1057_v7 = vld [vmem:[#allocation10 + $0xd4] ss:$8 sps:$4 sm:$0xff]  }
  0x64   :  { %v1052_v6 = vld [vmem:[#allocation10 + $0x1c0] ss:$8 sps:$4 sm:$0xff]   ;;  %v1060_v8 = vld [vmem:[#allocation10 + $0x1d4] ss:$8 sps:$4 sm:$0xff]   ;;  %v1055_v9 = vld [vmem:[#allocation10 + $0xd0] ss:$8 sps:$4 sm:$0xff]  }
  0x65   :  { %v1058_v10 = vld [vmem:[#allocation10 + $0x1d0] ss:$8 sps:$4 sm:$0xff]   ;;  %v1063_v11 = vld [vmem:[#allocation10 + $0xe4] ss:$8 sps:$4 sm:$0xff]   ;;  %v1061_v13 = vld [vmem:[#allocation10 + $0xe0] ss:$8 sps:$4 sm:$0xff]  }
  0x66   :  { %v1066_v12 = vld [vmem:[#allocation10 + $0x1e4] ss:$8 sps:$4 sm:$0xff]   ;;  %v1064_v14 = vld [vmem:[#allocation10 + $0x1e0] ss:$8 sps:$4 sm:$0xff]   ;;  %v1067_v15 = vld [vmem:[#allocation10 + $0xf0] ss:$8 sps:$4 sm:$0xff]  }
  0x67   :  { %v1069_v16 = vld [vmem:[#allocation10 + $0xf4] ss:$8 sps:$4 sm:$0xff]   ;;  %v1070_v17 = vld [vmem:[#allocation10 + $0x1f0] ss:$8 sps:$4 sm:$0xff]   ;;  %vm843_vm9 = vcmask 57344  }
  0xc2   :  { %v90_v18 = vpop.permute.xlu0 %89 }
  0xc3   :  { %93 = vst.msk [vmem:[#allocation2] sm:$0xff] %vm92_vm1, %v90_v18  ;;  %v1072_v18 = vld [vmem:[#allocation10 + $0x1f4] ss:$8 sps:$4 sm:$0xff]  }
  0xca   :  { %v94_v19 = vld [vmem:[#allocation2] sm:$0xff] }
  0xcb   :  { %v95_v22 = vpack.c.bf16 %v94_v19, %v94_v19  ;;  %v110_v19 = vlaneseq }
  0xcd   :  { %874 = vmatmul.mubr.msk.bf16.vlgmr.msra.gmra.mrb[0].mxu0 %vm190_vm2, %v95_v22  ;;  %875 = vmatmul.mubr.msk.bf16.vlgmr.msra.gmra.mrb[0].mxu1 %vm190_vm2, %v95_v22 }
  0xce   :  { %689 = vmatpush1.bf16.msra.mxu1 %v977_v20  ;;  %730 = vmatpush1.bf16.msra.mxu0 %v980_v21  ;;  %v111_v20 = vshrl.u32 %v110_v19, 7 }
  0xcf   :  { %690 = vmatprep.subr.bf16.mxu1 %v985_v23  ;;  %731 = vmatprep.subr.bf16.mxu0 %v988_v24  ;;  %v108_v23 = vld [vmem:[%s1333_s3] sm:$0xf] }
  0xd0   :  { %v1304_v21 = vsub.s32 0, %v111_v20  ;;  %v120_v22 = vsub.s32 2, %v111_v20  ;;  %v116_v24 = vsub.s32 1, %v111_v20 }
  0xd2   :  { %691 = vmatpush1.bf16.msra.mxu1 %v983_v25  ;;  %732 = vmatpush1.bf16.msra.mxu0 %v986_v26  ;;  %v124_v25 = vsub.s32 3, %v111_v20  ;;  %v113_v26 = vrot.slane %v108_v23, %v1304_v21 }
  0xd3   :  { %692 = vmatprep.subr.bf16.mxu1 %v991_v27  ;;  %733 = vmatprep.subr.bf16.mxu0 %v994_v28  ;;  %v121_v27 = vrot.slane %v108_v23, %v120_v22  ;;  %v117_v28 = vrot.slane %v108_v23, %v116_v24 }
  0xd6   :  { %693 = vmatpush1.bf16.msra.mxu1 %v989_v29  ;;  %734 = vmatpush1.bf16.msra.mxu0 %v992_v30  ;;  %v125_v29 = vrot.slane %v108_v23, %v124_v25 }
  0xd7   :  { %694 = vmatprep.subr.bf16.mxu1 %v997_v31  ;;  %735 = vmatprep.subr.bf16.mxu0 %v1000_v32 }
  0xda   :  { %695 = vmatpush1.bf16.msra.mxu1 %v995_v33  ;;  %736 = vmatpush1.bf16.msra.mxu0 %v998_v34 }
  0xdb   :  { %696 = vmatprep.subr.bf16.mxu1 %v1003_v35  ;;  %737 = vmatprep.subr.bf16.mxu0 %v1006_v36 }
  0xde   :  { %697 = vmatpush1.bf16.msra.mxu1 %v1001_v37  ;;  %738 = vmatpush1.bf16.msra.mxu0 %v1004_v38 }
  0xdf   :  { %698 = vmatprep.subr.bf16.mxu1 %v1009_v39  ;;  %739 = vmatprep.subr.bf16.mxu0 %v1012_v40 }
  0xe2   :  { %699 = vmatpush1.bf16.msra.mxu1 %v1007_v41  ;;  %740 = vmatpush1.bf16.msra.mxu0 %v1010_v42 }
  0xe3   :  { %700 = vmatprep.subr.bf16.mxu1 %v1015_v43  ;;  %741 = vmatprep.subr.bf16.mxu0 %v1018_v44 }
  0xe6   :  { %701 = vmatpush1.bf16.msra.mxu1 %v1013_v45  ;;  %742 = vmatpush1.bf16.msra.mxu0 %v1016_v46 }
  0xe7   :  { %702 = vmatprep.subr.bf16.mxu1 %v1021_v47  ;;  %743 = vmatprep.subr.bf16.mxu0 %v1024_v48 }
  0xea   :  { %703 = vmatpush1.bf16.msra.mxu1 %v1019_v49  ;;  %744 = vmatpush1.bf16.msra.mxu0 %v1022_v50 }
  0xeb   :  { %704 = vmatprep.subr.bf16.mxu1 %v1027_v51  ;;  %745 = vmatprep.subr.bf16.mxu0 %v1030_v52 }
  0xee   :  { %705 = vmatpush1.bf16.msra.mxu1 %v1025_v53  ;;  %746 = vmatpush1.bf16.msra.mxu0 %v1028_v54  ;;  %v776_v54 = vld [vmem:[%s1336_s6] sm:$0xff] }
  0xef   :  { %706 = vmatprep.subr.bf16.mxu1 %v1033_v55  ;;  %747 = vmatprep.subr.bf16.mxu0 %v1036_v56  ;;  %v941_v55 = vcombine.high %v776_v54, %v776_v54  ;;  %v826_v56 = vld [vmem:[#allocation3] sm:$0x1] }
  0xf0   :  { %829 = vperm.xlu0 %958, %v826_v56  }
  0xf2   :  { %707 = vmatpush1.bf16.msra.mxu1 %v1031_v57  ;;  %748 = vmatpush1.bf16.msra.mxu0 %v1034_v58  ;;  %v356_v57 = vld [vmem:[%s1335_s5] sm:$0x3]  ;;  %s1207_s5 = smov [#allocation12]  }
  0xf3   :  { %708 = vmatprep.subr.bf16.mxu1 %v1039_v59  ;;  %749 = vmatprep.subr.bf16.mxu0 %v1042_v60  ;;  %v361_v58 = vrot.slane %v356_v57, %v1304_v21  ;;  %v365_v59 = vrot.slane %v356_v57, %v116_v24  ;;  %s851_s6 = sshll.u32 %s1207_s5, 4  ;;  %s852_s6 = int_to_ptr.vmem [resolvable:$true] %s851_s6 }
  0xf4   :  { %s1167_s15 = scalar_lea.vmem %s852_s6, 16  ;;  %s1171_s7 = scalar_lea.vmem %s852_s6, 32 }
  0xf5   :  { %p1168_p4 = scmp.ne.s32.totalorder %s852_s6, %s1167_s15  ;;  %p1172_p5 = scmp.lt.s32.totalorder %s852_s6, %s852_s6 }
  0xf6   :  { %709 = vmatpush1.bf16.msra.mxu1 %v1037_v61  ;;  %750 = vmatpush1.bf16.msra.mxu0 %v1040_v62  ;;  %p1173_p6 = scmp.lt.s32.totalorder %s1171_s7, %s1167_s15 }
  0xf7   :  { %710 = vmatprep.subr.bf16.mxu1 %v1045_v63  ;;  %751 = vmatprep.subr.bf16.mxu0 %v1048_v0 }
  0xf8   :  { %p1174_p7 = por %p1173_p6, %p1172_p5 }
  0xfa   :  { %711 = vmatpush1.bf16.msra.mxu1 %v1043_v1  ;;  %752 = vmatpush1.bf16.msra.mxu0 %v1046_v2  ;;  %p1175_p8 = pnand %p1174_p7, %p1168_p4 }
  0xfb   :  { %712 = vmatprep.subr.bf16.mxu1 %v1051_v3  ;;  %753 = vmatprep.subr.bf16.mxu0 %v1054_v4 }
  0xfe   :  { %713 = vmatpush1.bf16.msra.mxu1 %v1049_v5  ;;  %754 = vmatpush1.bf16.msra.mxu0 %v1052_v6 }
  0xff   :  { %714 = vmatprep.subr.bf16.mxu1 %v1057_v7  ;;  %755 = vmatprep.subr.bf16.mxu0 %v1060_v8 }
 0x102   :  { %715 = vmatpush1.bf16.msra.mxu1 %v1055_v9  ;;  %756 = vmatpush1.bf16.msra.mxu0 %v1058_v10 }
 0x103   :  { %716 = vmatprep.subr.bf16.mxu1 %v1063_v11  ;;  %757 = vmatprep.subr.bf16.mxu0 %v1066_v12 }
 0x106   :  { %717 = vmatpush1.bf16.msra.mxu1 %v1061_v13  ;;  %758 = vmatpush1.bf16.msra.mxu0 %v1064_v14  ;;  %v940_v14 = vcombine.low %v776_v54, %v776_v54 }
 0x107   :  { %718 = vmatprep.subr.bf16.mxu1 %v1069_v16  ;;  %759 = vmatprep.subr.bf16.mxu0 %v1072_v18 }
 0x10a   :  { %719 = vmatpush1.bf16.msra.mxu1 %v1067_v15  ;;  %760 = vmatpush1.bf16.msra.mxu0 %v1070_v17 }
 0x16f   :  { %v830_v15 = vpop.permute.xlu0 %829 }
 0x170   :  { %v835_v16 = vrot.slane %v830_v15, %v1304_v21 }
 0x1a0   :  { %v228_v30 = vpop.f32.mrb[0].mxu0  ;;  %v269_v31 = vpop.f32.mrb[0].mxu1 }
 0x1a1   :  { %v229_v32 = vadd.f32 %v228_v30, %v113_v26  ;;  %v270_v33 = vadd.f32 %v269_v31, %v121_v27  ;;  %v230_v34 = vpop.f32.mrb[1].mxu0  ;;  %v271_v35 = vpop.f32.mrb[1].mxu1 }
 0x1a2   :  { %v231_v36 = vadd.f32 %v230_v34, %v117_v28  ;;  %v272_v37 = vadd.f32 %v271_v35, %v125_v29  ;;  %v232_v38 = vpop.f32.mrb[2].mxu0  ;;  %v273_v39 = vpop.f32.mrb[2].mxu1 }
 0x1a3   :  { %vm276_vm3 = vcmp.gt.f32.partialorder %v229_v32, 0.0  ;;  %v280_v40 = vmul.f32 0.2, %v229_v32  ;;  %vm278_vm4 = vcmp.gt.f32.partialorder %v270_v33, 0.0  ;;  %v282_v41 = vmul.f32 0.2, %v270_v33 }
 0x1a4   :  { %vm277_vm5 = vcmp.gt.f32.partialorder %v231_v36, 0.0  ;;  %v281_v42 = vmul.f32 0.2, %v231_v36  ;;  %vm279_vm6 = vcmp.gt.f32.partialorder %v272_v37, 0.0  ;;  %v283_v43 = vmul.f32 0.2, %v272_v37 }
 0x1a5   :  { %v284_v44 = vsel %vm276_vm3, %v229_v32, %v280_v40  ;;  %v286_v45 = vsel %vm278_vm4, %v270_v33, %v282_v41  ;;  %v233_v46 = vpop.f32.mrb[3].mxu0  ;;  %v274_v47 = vpop.f32.mrb[3].mxu1 }
 0x1a6   :  { %v285_v48 = vsel %vm277_vm5, %v231_v36, %v281_v42  ;;  %v287_v49 = vsel %vm279_vm6, %v272_v37, %v283_v43  ;;  %v288_v52 = vpack.c.bf16 %v284_v44, %v284_v44  ;;  %v290_v53 = vpack.c.bf16 %v286_v45, %v286_v45 }
 0x1a7   :  { %v289_v50 = vpack.c.bf16 %v285_v48, %v285_v48  ;;  %v291_v51 = vpack.c.bf16 %v287_v49, %v287_v49 }
 0x1a9   :  { %720 = vmatprep.mubr.bf16.mxu1 %v289_v50  ;;  %761 = vmatprep.mubr.bf16.mxu0 %v291_v51 }
 0x1aa   :  { %721 = vmatmul.mubr.bf16.vlgmr.msra.gmra.mrb[4].mxu1 %v288_v52  ;;  %762 = vmatmul.mubr.bf16.vlgmr.msra.gmra.mrb[4].mxu0 %v290_v53 }
 0x1ab   :  { %818 = vmatprep.mubr.bf16.mxu1 %v941_v55 }
 0x27d   :  { %v722_v60 = vpop.f32.mrb[4].mxu1  ;;  %v763_v61 = vpop.f32.mrb[4].mxu0 }
 0x27e   :  { %v723_v62 = vadd.f32 %v722_v60, %v361_v58  ;;  %v724_v63 = vpop.f32.mrb[5].mxu1  ;;  %v765_v0 = vpop.f32.mrb[5].mxu0 }
 0x27f   :  { %v725_v1 = vadd.f32 %v724_v63, %v365_v59  ;;  %v726_v2 = vpop.f32.mrb[6].mxu1  ;;  %v767_v3 = vpop.f32.mrb[6].mxu0 }
 0x280   :  { %v764_v4 = vadd.f32 %v763_v61, %v723_v62  ;;  %v727_v5 = vpop.f32.mrb[7].mxu1  ;;  %v768_v6 = vpop.f32.mrb[7].mxu0 }
 0x281   :  { %v766_v7 = vadd.f32 %v765_v0, %v725_v1 }
 0x282   :  { %vm770_vm7 = vcmp.gt.f32.partialorder %v764_v4, 0.0  ;;  %v772_v8 = vmul.f32 0.2, %v764_v4 }
 0x283   :  { %vm771_vm8 = vcmp.gt.f32.partialorder %v766_v7, 0.0  ;;  %v773_v9 = vmul.f32 0.2, %v766_v7 }
 0x284   :  { %v774_v10 = vsel %vm770_vm7, %v764_v4, %v772_v8 }
 0x285   :  { %v775_v11 = vsel %vm771_vm8, %v766_v7, %v773_v9  ;;  %v777_v13 = vpack.c.bf16 %v774_v10, %v774_v10 }
 0x286   :  { %v778_v12 = vpack.c.bf16 %v775_v11, %v775_v11 }
 0x288   :  { %786 = vmatprep.subr.bf16.mxu1 %v778_v12 }
 0x289   :  { %787 = vmatpush1.bf16.xpose.msra.mxu1 %v777_v13 }
 0x290   :  { %819 = vmatmul.mubr.bf16.vlgmr.msra.gmra.mrb[8].mxu1 %v940_v14 }
 0x363   :  { %v820_v17 = vpop.f32.mrb[8].mxu1 }
 0x364   :  { %v836_v18 = vadd.f32 %v835_v16, %v820_v17  ;;  %v822_v19 = vpop.f32.mrb[9].mxu1 }
 0x365   :  { %v823_v20 = vpop.f32.mrb[10].mxu1 }
 0x366   :  { %v942_v22 = vmul.f32 -1.442695, %v836_v18  ;;  %v824_v23 = vpop.f32.mrb[11].mxu1 }
 0x368   :  { %1075 = vpow2.f32 %v942_v22 }
 0x372   :  { %v1076_v24 = vpop.eup %1075 }
 0x373   :  { %v840_v25 = vadd.f32 1.0, %v1076_v24 }
 0x375   :  { %1077 = vrcp.f32 %v840_v25 }
 0x37f   :  { %v1078_v26 = vpop.eup %1077 }
 0x380   :  { %844 = vst.msk [vmem:[#allocation12] sm:$0x1] %vm843_vm9, %v1078_v26 }
 0x381   :  { %1178 = shalt.err (!%p1175_p8)
}
 0x382   :  { %s1179_s10 = scalar_lea.hbm %s1338_s8, 16 }
 0x383   :  { %p1180_p9 = scmp.ne.s32.totalorder %s1338_s8, %s1179_s10  ;;  %p1183_p10 = scmp.lt.u32.totalorder %s1179_s10, %s1338_s8 }
 0x385   :  { %p1185_p11 = pnand %p1183_p10, %p1180_p9 }
 0x387   :  { %1188 = shalt.err (!%p1185_p11)
}
 0x388   :  { %854 = dma.vmem_to_hbm [thread:$0]  %s852_s6, 16, %s1338_s8, [#allocation6]  }
 0x389   :  { %1195 = dma.done.wait [#allocation6], 16  }
 0x38a   :  { %1196 = vsyncadd [#allocation6], 4294967280 }
 0x38b   :  { %858 = vsyncpa [#allocation5], 1 }
 0x38c   :  { %859 = vsyncpa [#allocation8], 1 }
 0x38d   :  { %860 = vsyncpa [#allocation11], 1 }
 0x38e   :  { %861 = vsyncpa [#allocation6], 1 }

</bundles_post_ra>
